<compile_context>
chip_gen: v7x
topology: tpu7x:2x2x1
jax: 0.10.0
libtpu: 0.0.40
codegen_flags: <defaults>
</compile_context>

<pallas_src>
import jax
import jax.numpy as jnp
from jax.experimental import pallas as pl
from jax.experimental.pallas import tpu as pltpu

# ----------------------------- configuration --------------------------------
B, C, H, W = 2, 4, 16, 16          # input shape (NCHW)
HW = H * W                         # 256 -> lane axis inside the kernel
HALF = C // 2
HIDDEN = 32                        # subnet hidden width
N_BLOCKS = 3                       # number of coupling blocks appended
CLAMP = 2.0                        # clamp for the affine scale (like AllInOneBlock)


# ------------------------------- the kernel ---------------------------------
def revseq_kernel(x_ref, w1t_ref, b1_ref, w2t_ref, b2_ref, z_ref, jac_ref):
    """One grid program processes one batch element, channels-first.

    x_ref  : (1, C, HW)              input (channels on sublanes, HW on lanes)
    w1t_ref: (N_BLOCKS, HIDDEN, HALF)   W1^T per block
    b1_ref : (N_BLOCKS, HIDDEN, 1)      column-shaped bias
    w2t_ref: (N_BLOCKS, C, HIDDEN)      W2^T per block
    b2_ref : (N_BLOCKS, C, 1)           column-shaped bias
    z_ref  : (1, C, HW)              output
    jac_ref: (1, 1, 128)             per-sample log|det J| (wrapper reads [0,0])
    """
    x = x_ref[0].astype(jnp.float32)         # (C, HW), lane-dense
    x1 = x[:HALF, :]                         # (HALF, HW)  sublane slice (once)
    x2 = x[HALF:, :]                         # (HALF, HW)
    jac = jnp.float32(0.0)

    for i in range(N_BLOCKS):                # static, unrolled block loop
        w1t = w1t_ref[i]                     # (HIDDEN, HALF)
        b1c = b1_ref[i]                      # (HIDDEN, 1)
        w2t = w2t_ref[i]                     # (C, HIDDEN)
        b2c = b2_ref[i]                      # (C, 1)

        # --- subnet layer 1: depth-2 contraction done on the VPU as FMAs ----
        h = b1c                              # broadcast (HIDDEN,1) over lanes
        for k in range(HALF):
            h = h + w1t[:, k:k + 1] * x1[k:k + 1, :]     # (HIDDEN, HW)
        h = jnp.maximum(h, 0.0)              # ReLU

        # --- subnet layer 2: K=HIDDEN contraction on the MXU -----------------
        st = jnp.dot(w2t, h, preferred_element_type=jnp.float32) + b2c  # (C, HW)

        s = CLAMP * jnp.tanh(st[:HALF, :])   # clamped log-scale  (HALF, HW)
        t = st[HALF:, :]                     # translation        (HALF, HW)

        y2 = x2 * jnp.exp(s) + t             # affine coupling
        jac = jac + jnp.sum(s)               # log|det J| contribution

        # fixed half-swap permutation between blocks (log-det 0): pure swap
        x1, x2 = y2, x1

    z = jnp.concatenate([x1, x2], axis=0)    # single sublane concat at the end
    z_ref[0] = z.astype(z_ref.dtype)
    jac_ref[...] = jnp.full((1, 1, 128), jac, dtype=jnp.float32)


# ------------------------------- the wrapper ---------------------------------
def reversible_sequential_forward(x_nchw, w1, b1, w2, b2):
    """Runs the whole sequential INN forward. Returns (z_nchw, jac[B])."""
    # NCHW -> (B, C, HW): contiguous reshape, no transpose, HW stays innermost.
    x_rows = x_nchw.reshape(B, C, HW)

    # Pre-transpose / reshape the tiny subnet parameters for channels-first use.
    w1t = jnp.transpose(w1, (0, 2, 1))       # (N_BLOCKS, HIDDEN, HALF)
    w2t = jnp.transpose(w2, (0, 2, 1))       # (N_BLOCKS, C, HIDDEN)
    b1c = b1[:, :, None]                     # (N_BLOCKS, HIDDEN, 1)
    b2c = b2[:, :, None]                     # (N_BLOCKS, C, 1)

    grid_spec = pltpu.PrefetchScalarGridSpec(
        num_scalar_prefetch=0,
        grid=(B,),
        in_specs=[
            pl.BlockSpec((1, C, HW), lambda b: (b, 0, 0)),
            pl.BlockSpec((N_BLOCKS, HIDDEN, HALF), lambda b: (0, 0, 0)),
            pl.BlockSpec((N_BLOCKS, HIDDEN, 1), lambda b: (0, 0, 0)),
            pl.BlockSpec((N_BLOCKS, C, HIDDEN), lambda b: (0, 0, 0)),
            pl.BlockSpec((N_BLOCKS, C, 1), lambda b: (0, 0, 0)),
        ],
        out_specs=[
            pl.BlockSpec((1, C, HW), lambda b: (b, 0, 0)),
            pl.BlockSpec((1, 1, 128), lambda b: (b, 0, 0)),
        ],
    )

    z_rows, jac_tile = pl.pallas_call(
        revseq_kernel,
        out_shape=(
            jax.ShapeDtypeStruct((B, C, HW), jnp.float32),
            jax.ShapeDtypeStruct((B, 1, 128), jnp.float32),
        ),
        grid_spec=grid_spec,
        compiler_params=pltpu.CompilerParams(
            dimension_semantics=("parallel",)),  # shards batch over v7x's 2 TCs
    )(x_rows, w1t, b1c, w2t, b2c)

    z_nchw = z_rows.reshape(B, C, H, W)      # contiguous reshape back, free
    jac = jac_tile[:, 0, 0]
    return z_nchw, jac


# --------------------------- pure-JAX reference ------------------------------
def reference_forward(x_nchw, w1, b1, w2, b2):
    x = jnp.transpose(x_nchw, (0, 2, 3, 1)).reshape(B, HW, C)
    jac = jnp.zeros((B,), jnp.float32)
    for i in range(N_BLOCKS):
        x1, x2 = x[..., :HALF], x[..., HALF:]
        h = jax.nn.relu(jnp.einsum('bnc,ch->bnh', x1, w1[i]) + b1[i])
        st = jnp.einsum('bnh,hc->bnc', h, w2[i]) + b2[i]
        s = CLAMP * jnp.tanh(st[..., :HALF])
        t = st[..., HALF:]
        y2 = x2 * jnp.exp(s) + t
        jac = jac + jnp.sum(s, axis=(1, 2))
        x = jnp.concatenate([y2, x1], axis=-1)
    z = jnp.transpose(x.reshape(B, H, W, C), (0, 3, 1, 2))
    return z, jac


# ----------------------------------- main ------------------------------------
if __name__ == "__main__":
    key = jax.random.PRNGKey(0)
    kx, kw1, kb1, kw2, kb2 = jax.random.split(key, 5)

    x = jax.random.normal(kx, (B, C, H, W), dtype=jnp.float32)

    # deterministic synthetic parameters for the N_BLOCKS coupling subnets
    w1 = 0.2 * jax.random.normal(kw1, (N_BLOCKS, HALF, HIDDEN), dtype=jnp.float32)
    b1 = 0.1 * jax.random.normal(kb1, (N_BLOCKS, HIDDEN), dtype=jnp.float32)
    w2 = 0.2 * jax.random.normal(kw2, (N_BLOCKS, HIDDEN, C), dtype=jnp.float32)
    b2 = 0.1 * jax.random.normal(kb2, (N_BLOCKS, C), dtype=jnp.float32)

    # TODO(synk): rev=True (inverse) path and conditioning inputs of
    # ReversibleSequential are not implemented; forward, unconditioned only.
    z, jac = jax.block_until_ready(
        reversible_sequential_forward(x, w1, b1, w2, b2))

    z_ref, jac_ref = reference_forward(x, w1, b1, w2, b2)

    assert z.shape == (B, C, H, W) and jac.shape == (B,)
    assert jnp.allclose(z, z_ref, rtol=1e-4, atol=1e-4), "z mismatch vs reference"
    assert jnp.allclose(jac, jac_ref, rtol=1e-4, atol=1e-4), "jac mismatch vs reference"

    print("KERNEL_OK")
</pallas_src>

<mosaic_0001>
module attributes {stable_mosaic.version = 11 : i64} {
  func.func @revseq_kernel(%arg0: i32, %arg1: memref<1x4x256xf32, #tpu.memory_space<vmem>>, %arg2: memref<3x32x2xf32, #tpu.memory_space<vmem>>, %arg3: memref<3x32x1xf32, #tpu.memory_space<vmem>>, %arg4: memref<3x4x32xf32, #tpu.memory_space<vmem>>, %arg5: memref<3x4x1xf32, #tpu.memory_space<vmem>>, %arg6: memref<1x4x256xf32, #tpu.memory_space<vmem>>, %arg7: memref<1x1x128xf32, #tpu.memory_space<vmem>>) attributes {dimension_semantics = [#tpu.dimension_semantics<parallel>], iteration_bounds = array<i64: 2>, scalar_prefetch = 0 : i64, scratch_operands = 0 : i64, tpu.core_type = #tpu.core_type<tc>, window_params = [{transform_indices = @transform_0, window_bounds = array<i64: 1, 4, 256>}, {pipeline_mode = #tpu.pipeline_mode<synchronous>, transform_indices = @transform_1, window_bounds = array<i64: 3, 32, 2>}, {pipeline_mode = #tpu.pipeline_mode<synchronous>, transform_indices = @transform_2, window_bounds = array<i64: 3, 32, 1>}, {pipeline_mode = #tpu.pipeline_mode<synchronous>, transform_indices = @transform_3, window_bounds = array<i64: 3, 4, 32>}, {pipeline_mode = #tpu.pipeline_mode<synchronous>, transform_indices = @transform_4, window_bounds = array<i64: 3, 4, 1>}, {transform_indices = @transform_5, window_bounds = array<i64: 1, 4, 256>}, {transform_indices = @transform_6, window_bounds = array<i64: 1, 1, 128>}]} {
    %c0 = arith.constant 0 : index
    %c0_0 = arith.constant 0 : index
    %c0_1 = arith.constant 0 : index
    %0 = vector.load %arg1[%c0, %c0_0, %c0_1] : memref<1x4x256xf32, #tpu.memory_space<vmem>>, vector<1x4x256xf32>
    %1 = vector.shape_cast %0 : vector<1x4x256xf32> to vector<4x256xf32>
    %2 = vector.extract_strided_slice %1 {offsets = [0, 0], sizes = [2, 256], strides = [1, 1]} : vector<4x256xf32> to vector<2x256xf32>
    %3 = vector.extract_strided_slice %1 {offsets = [2, 0], sizes = [2, 256], strides = [1, 1]} : vector<4x256xf32> to vector<2x256xf32>
    %c0_2 = arith.constant 0 : index
    %c0_3 = arith.constant 0 : index
    %c0_4 = arith.constant 0 : index
    %4 = vector.load %arg2[%c0_2, %c0_3, %c0_4] : memref<3x32x2xf32, #tpu.memory_space<vmem>>, vector<1x32x2xf32>
    %5 = vector.shape_cast %4 : vector<1x32x2xf32> to vector<32x2xf32>
    %c0_5 = arith.constant 0 : index
    %c0_6 = arith.constant 0 : index
    %c0_7 = arith.constant 0 : index
    %6 = vector.load %arg3[%c0_5, %c0_6, %c0_7] : memref<3x32x1xf32, #tpu.memory_space<vmem>>, vector<1x32x1xf32>
    %7 = vector.shape_cast %6 : vector<1x32x1xf32> to vector<32x1xf32>
    %c0_8 = arith.constant 0 : index
    %c0_9 = arith.constant 0 : index
    %c0_10 = arith.constant 0 : index
    %8 = vector.load %arg4[%c0_8, %c0_9, %c0_10] : memref<3x4x32xf32, #tpu.memory_space<vmem>>, vector<1x4x32xf32>
    %9 = vector.shape_cast %8 : vector<1x4x32xf32> to vector<4x32xf32>
    %c0_11 = arith.constant 0 : index
    %c0_12 = arith.constant 0 : index
    %c0_13 = arith.constant 0 : index
    %10 = vector.load %arg5[%c0_11, %c0_12, %c0_13] : memref<3x4x1xf32, #tpu.memory_space<vmem>>, vector<1x4x1xf32>
    %11 = vector.shape_cast %10 : vector<1x4x1xf32> to vector<4x1xf32>
    %12 = vector.extract_strided_slice %5 {offsets = [0, 0], sizes = [32, 1], strides = [1, 1]} : vector<32x2xf32> to vector<32x1xf32>
    %13 = vector.extract_strided_slice %2 {offsets = [0, 0], sizes = [1, 256], strides = [1, 1]} : vector<2x256xf32> to vector<1x256xf32>
    %14 = vector.broadcast %12 : vector<32x1xf32> to vector<32x256xf32>
    %15 = vector.broadcast %13 : vector<1x256xf32> to vector<32x256xf32>
    %16 = arith.mulf %14, %15 : vector<32x256xf32>
    %17 = vector.broadcast %7 : vector<32x1xf32> to vector<32x256xf32>
    %18 = arith.addf %17, %16 : vector<32x256xf32>
    %19 = vector.extract_strided_slice %5 {offsets = [0, 1], sizes = [32, 1], strides = [1, 1]} : vector<32x2xf32> to vector<32x1xf32>
    %20 = vector.extract_strided_slice %2 {offsets = [1, 0], sizes = [1, 256], strides = [1, 1]} : vector<2x256xf32> to vector<1x256xf32>
    %21 = vector.broadcast %19 : vector<32x1xf32> to vector<32x256xf32>
    %22 = vector.broadcast %20 : vector<1x256xf32> to vector<32x256xf32>
    %23 = arith.mulf %21, %22 : vector<32x256xf32>
    %24 = arith.addf %18, %23 : vector<32x256xf32>
    %cst = arith.constant 0.000000e+00 : f32
    %25 = vector.broadcast %cst : f32 to vector<32x256xf32>
    %26 = arith.maximumf %24, %25 : vector<32x256xf32>
    %cst_14 = arith.constant dense<0.000000e+00> : vector<4x256xf32>
    %27 = tpu.matmul %9, %26, %cst_14 {dimension_numbers = #tpu.dot_dimension_numbers<[1], [0], [0], [1], [0, 0, 1, 1], [], []>} : vector<4x32xf32>, vector<32x256xf32>, vector<4x256xf32> -> vector<4x256xf32>
    %28 = vector.broadcast %11 : vector<4x1xf32> to vector<4x256xf32>
    %29 = arith.addf %27, %28 : vector<4x256xf32>
    %30 = vector.extract_strided_slice %29 {offsets = [0, 0], sizes = [2, 256], strides = [1, 1]} : vector<4x256xf32> to vector<2x256xf32>
    %31 = math.tanh %30 : vector<2x256xf32>
    %cst_15 = arith.constant 2.000000e+00 : f32
    %32 = vector.broadcast %cst_15 : f32 to vector<2x256xf32>
    %33 = arith.mulf %32, %31 : vector<2x256xf32>
    %34 = vector.extract_strided_slice %29 {offsets = [2, 0], sizes = [2, 256], strides = [1, 1]} : vector<4x256xf32> to vector<2x256xf32>
    %35 = math.exp %33 : vector<2x256xf32>
    %36 = arith.mulf %3, %35 : vector<2x256xf32>
    %37 = arith.addf %36, %34 : vector<2x256xf32>
    %38 = vector.shape_cast %33 : vector<2x256xf32> to vector<1x2x256xf32>
    %cst_16 = arith.constant dense<0.000000e+00> : vector<1xf32>
    %39 = vector.multi_reduction <add>, %38, %cst_16 [1, 2] : vector<1x2x256xf32> to vector<1xf32>
    %40 = vector.shape_cast %39 : vector<1xf32> to vector<1x1x1xf32>
    %41 = vector.extract %40[0, 0, 0] : f32 from vector<1x1x1xf32>
    %cst_17 = arith.constant 0.000000e+00 : f32
    %42 = arith.addf %cst_17, %41 : f32
    %c1 = arith.constant 1 : index
    %c0_18 = arith.constant 0 : index
    %c0_19 = arith.constant 0 : index
    %43 = vector.load %arg2[%c1, %c0_18, %c0_19] : memref<3x32x2xf32, #tpu.memory_space<vmem>>, vector<1x32x2xf32>
    %44 = vector.shape_cast %43 : vector<1x32x2xf32> to vector<32x2xf32>
    %c1_20 = arith.constant 1 : index
    %c0_21 = arith.constant 0 : index
    %c0_22 = arith.constant 0 : index
    %45 = vector.load %arg3[%c1_20, %c0_21, %c0_22] : memref<3x32x1xf32, #tpu.memory_space<vmem>>, vector<1x32x1xf32>
    %46 = vector.shape_cast %45 : vector<1x32x1xf32> to vector<32x1xf32>
    %c1_23 = arith.constant 1 : index
    %c0_24 = arith.constant 0 : index
    %c0_25 = arith.constant 0 : index
    %47 = vector.load %arg4[%c1_23, %c0_24, %c0_25] : memref<3x4x32xf32, #tpu.memory_space<vmem>>, vector<1x4x32xf32>
    %48 = vector.shape_cast %47 : vector<1x4x32xf32> to vector<4x32xf32>
    %c1_26 = arith.constant 1 : index
    %c0_27 = arith.constant 0 : index
    %c0_28 = arith.constant 0 : index
    %49 = vector.load %arg5[%c1_26, %c0_27, %c0_28] : memref<3x4x1xf32, #tpu.memory_space<vmem>>, vector<1x4x1xf32>
    %50 = vector.shape_cast %49 : vector<1x4x1xf32> to vector<4x1xf32>
    %51 = vector.extract_strided_slice %44 {offsets = [0, 0], sizes = [32, 1], strides = [1, 1]} : vector<32x2xf32> to vector<32x1xf32>
    %52 = vector.extract_strided_slice %37 {offsets = [0, 0], sizes = [1, 256], strides = [1, 1]} : vector<2x256xf32> to vector<1x256xf32>
    %53 = vector.broadcast %51 : vector<32x1xf32> to vector<32x256xf32>
    %54 = vector.broadcast %52 : vector<1x256xf32> to vector<32x256xf32>
    %55 = arith.mulf %53, %54 : vector<32x256xf32>
    %56 = vector.broadcast %46 : vector<32x1xf32> to vector<32x256xf32>
    %57 = arith.addf %56, %55 : vector<32x256xf32>
    %58 = vector.extract_strided_slice %44 {offsets = [0, 1], sizes = [32, 1], strides = [1, 1]} : vector<32x2xf32> to vector<32x1xf32>
    %59 = vector.extract_strided_slice %37 {offsets = [1, 0], sizes = [1, 256], strides = [1, 1]} : vector<2x256xf32> to vector<1x256xf32>
    %60 = vector.broadcast %58 : vector<32x1xf32> to vector<32x256xf32>
    %61 = vector.broadcast %59 : vector<1x256xf32> to vector<32x256xf32>
    %62 = arith.mulf %60, %61 : vector<32x256xf32>
    %63 = arith.addf %57, %62 : vector<32x256xf32>
    %cst_29 = arith.constant 0.000000e+00 : f32
    %64 = vector.broadcast %cst_29 : f32 to vector<32x256xf32>
    %65 = arith.maximumf %63, %64 : vector<32x256xf32>
    %cst_30 = arith.constant dense<0.000000e+00> : vector<4x256xf32>
    %66 = tpu.matmul %48, %65, %cst_30 {dimension_numbers = #tpu.dot_dimension_numbers<[1], [0], [0], [1], [0, 0, 1, 1], [], []>} : vector<4x32xf32>, vector<32x256xf32>, vector<4x256xf32> -> vector<4x256xf32>
    %67 = vector.broadcast %50 : vector<4x1xf32> to vector<4x256xf32>
    %68 = arith.addf %66, %67 : vector<4x256xf32>
    %69 = vector.extract_strided_slice %68 {offsets = [0, 0], sizes = [2, 256], strides = [1, 1]} : vector<4x256xf32> to vector<2x256xf32>
    %70 = math.tanh %69 : vector<2x256xf32>
    %cst_31 = arith.constant 2.000000e+00 : f32
    %71 = vector.broadcast %cst_31 : f32 to vector<2x256xf32>
    %72 = arith.mulf %71, %70 : vector<2x256xf32>
    %73 = vector.extract_strided_slice %68 {offsets = [2, 0], sizes = [2, 256], strides = [1, 1]} : vector<4x256xf32> to vector<2x256xf32>
    %74 = math.exp %72 : vector<2x256xf32>
    %75 = arith.mulf %2, %74 : vector<2x256xf32>
    %76 = arith.addf %75, %73 : vector<2x256xf32>
    %77 = vector.shape_cast %72 : vector<2x256xf32> to vector<1x2x256xf32>
    %cst_32 = arith.constant dense<0.000000e+00> : vector<1xf32>
    %78 = vector.multi_reduction <add>, %77, %cst_32 [1, 2] : vector<1x2x256xf32> to vector<1xf32>
    %79 = vector.shape_cast %78 : vector<1xf32> to vector<1x1x1xf32>
    %80 = vector.extract %79[0, 0, 0] : f32 from vector<1x1x1xf32>
    %81 = arith.addf %42, %80 : f32
    %c2 = arith.constant 2 : index
    %c0_33 = arith.constant 0 : index
    %c0_34 = arith.constant 0 : index
    %82 = vector.load %arg2[%c2, %c0_33, %c0_34] : memref<3x32x2xf32, #tpu.memory_space<vmem>>, vector<1x32x2xf32>
    %83 = vector.shape_cast %82 : vector<1x32x2xf32> to vector<32x2xf32>
    %c2_35 = arith.constant 2 : index
    %c0_36 = arith.constant 0 : index
    %c0_37 = arith.constant 0 : index
    %84 = vector.load %arg3[%c2_35, %c0_36, %c0_37] : memref<3x32x1xf32, #tpu.memory_space<vmem>>, vector<1x32x1xf32>
    %85 = vector.shape_cast %84 : vector<1x32x1xf32> to vector<32x1xf32>
    %c2_38 = arith.constant 2 : index
    %c0_39 = arith.constant 0 : index
    %c0_40 = arith.constant 0 : index
    %86 = vector.load %arg4[%c2_38, %c0_39, %c0_40] : memref<3x4x32xf32, #tpu.memory_space<vmem>>, vector<1x4x32xf32>
    %87 = vector.shape_cast %86 : vector<1x4x32xf32> to vector<4x32xf32>
    %c2_41 = arith.constant 2 : index
    %c0_42 = arith.constant 0 : index
    %c0_43 = arith.constant 0 : index
    %88 = vector.load %arg5[%c2_41, %c0_42, %c0_43] : memref<3x4x1xf32, #tpu.memory_space<vmem>>, vector<1x4x1xf32>
    %89 = vector.shape_cast %88 : vector<1x4x1xf32> to vector<4x1xf32>
    %90 = vector.extract_strided_slice %83 {offsets = [0, 0], sizes = [32, 1], strides = [1, 1]} : vector<32x2xf32> to vector<32x1xf32>
    %91 = vector.extract_strided_slice %76 {offsets = [0, 0], sizes = [1, 256], strides = [1, 1]} : vector<2x256xf32> to vector<1x256xf32>
    %92 = vector.broadcast %90 : vector<32x1xf32> to vector<32x256xf32>
    %93 = vector.broadcast %91 : vector<1x256xf32> to vector<32x256xf32>
    %94 = arith.mulf %92, %93 : vector<32x256xf32>
    %95 = vector.broadcast %85 : vector<32x1xf32> to vector<32x256xf32>
    %96 = arith.addf %95, %94 : vector<32x256xf32>
    %97 = vector.extract_strided_slice %83 {offsets = [0, 1], sizes = [32, 1], strides = [1, 1]} : vector<32x2xf32> to vector<32x1xf32>
    %98 = vector.extract_strided_slice %76 {offsets = [1, 0], sizes = [1, 256], strides = [1, 1]} : vector<2x256xf32> to vector<1x256xf32>
    %99 = vector.broadcast %97 : vector<32x1xf32> to vector<32x256xf32>
    %100 = vector.broadcast %98 : vector<1x256xf32> to vector<32x256xf32>
    %101 = arith.mulf %99, %100 : vector<32x256xf32>
    %102 = arith.addf %96, %101 : vector<32x256xf32>
    %cst_44 = arith.constant 0.000000e+00 : f32
    %103 = vector.broadcast %cst_44 : f32 to vector<32x256xf32>
    %104 = arith.maximumf %102, %103 : vector<32x256xf32>
    %cst_45 = arith.constant dense<0.000000e+00> : vector<4x256xf32>
    %105 = tpu.matmul %87, %104, %cst_45 {dimension_numbers = #tpu.dot_dimension_numbers<[1], [0], [0], [1], [0, 0, 1, 1], [], []>} : vector<4x32xf32>, vector<32x256xf32>, vector<4x256xf32> -> vector<4x256xf32>
    %106 = vector.broadcast %89 : vector<4x1xf32> to vector<4x256xf32>
    %107 = arith.addf %105, %106 : vector<4x256xf32>
    %108 = vector.extract_strided_slice %107 {offsets = [0, 0], sizes = [2, 256], strides = [1, 1]} : vector<4x256xf32> to vector<2x256xf32>
    %109 = math.tanh %108 : vector<2x256xf32>
    %cst_46 = arith.constant 2.000000e+00 : f32
    %110 = vector.broadcast %cst_46 : f32 to vector<2x256xf32>
    %111 = arith.mulf %110, %109 : vector<2x256xf32>
    %112 = vector.extract_strided_slice %107 {offsets = [2, 0], sizes = [2, 256], strides = [1, 1]} : vector<4x256xf32> to vector<2x256xf32>
    %113 = math.exp %111 : vector<2x256xf32>
    %114 = arith.mulf %37, %113 : vector<2x256xf32>
    %115 = arith.addf %114, %112 : vector<2x256xf32>
    %116 = vector.shape_cast %111 : vector<2x256xf32> to vector<1x2x256xf32>
    %cst_47 = arith.constant dense<0.000000e+00> : vector<1xf32>
    %117 = vector.multi_reduction <add>, %116, %cst_47 [1, 2] : vector<1x2x256xf32> to vector<1xf32>
    %118 = vector.shape_cast %117 : vector<1xf32> to vector<1x1x1xf32>
    %119 = vector.extract %118[0, 0, 0] : f32 from vector<1x1x1xf32>
    %120 = arith.addf %81, %119 : f32
    %121 = tpu.concatenate %115, %76 in 0 : vector<2x256xf32>, vector<2x256xf32> -> vector<4x256xf32>
    %c0_48 = arith.constant 0 : index
    %c0_49 = arith.constant 0 : index
    %c0_50 = arith.constant 0 : index
    %122 = vector.load %arg6[%c0_48, %c0_49, %c0_50] : memref<1x4x256xf32, #tpu.memory_space<vmem>>, vector<1x4x256xf32>
    %123 = vector.shape_cast %122 : vector<1x4x256xf32> to vector<4x256xf32>
    %124 = vector.shape_cast %121 : vector<4x256xf32> to vector<1x4x256xf32>
    tpu.vector_store %arg6[%c0_48, %c0_49, %c0_50], %124 {strides = array<i32>} : memref<1x4x256xf32, #tpu.memory_space<vmem>>, vector<1x4x256xf32>,
    %125 = vector.broadcast %120 : f32 to vector<1x1x128xf32>
    %c0_51 = arith.constant 0 : index
    %c0_52 = arith.constant 0 : index
    %c0_53 = arith.constant 0 : index
    %126 = vector.load %arg7[%c0_51, %c0_52, %c0_53] : memref<1x1x128xf32, #tpu.memory_space<vmem>>, vector<1x1x128xf32>
    tpu.vector_store %arg7[%c0_51, %c0_52, %c0_53], %125 {strides = array<i32>} : memref<1x1x128xf32, #tpu.memory_space<vmem>>, vector<1x1x128xf32>,
    return
  }
  func.func @transform_0(%arg0: i32) -> (i32, i32, i32) {
    %c0_i32 = arith.constant 0 : i32
    %c0_i32_0 = arith.constant 0 : i32
    %c0_i32_1 = arith.constant 0 : i32
    return %arg0, %c0_i32, %c0_i32_0 : i32, i32, i32
  }
  func.func @transform_1(%arg0: i32) -> (i32, i32, i32) {
    %c0_i32 = arith.constant 0 : i32
    %c0_i32_0 = arith.constant 0 : i32
    %c0_i32_1 = arith.constant 0 : i32
    %c0_i32_2 = arith.constant 0 : i32
    return %c0_i32, %c0_i32_0, %c0_i32_1 : i32, i32, i32
  }
  func.func @transform_2(%arg0: i32) -> (i32, i32, i32) {
    %c0_i32 = arith.constant 0 : i32
    %c0_i32_0 = arith.constant 0 : i32
    %c0_i32_1 = arith.constant 0 : i32
    %c0_i32_2 = arith.constant 0 : i32
    return %c0_i32, %c0_i32_0, %c0_i32_1 : i32, i32, i32
  }
  func.func @transform_3(%arg0: i32) -> (i32, i32, i32) {
    %c0_i32 = arith.constant 0 : i32
    %c0_i32_0 = arith.constant 0 : i32
    %c0_i32_1 = arith.constant 0 : i32
    %c0_i32_2 = arith.constant 0 : i32
    return %c0_i32, %c0_i32_0, %c0_i32_1 : i32, i32, i32
  }
  func.func @transform_4(%arg0: i32) -> (i32, i32, i32) {
    %c0_i32 = arith.constant 0 : i32
    %c0_i32_0 = arith.constant 0 : i32
    %c0_i32_1 = arith.constant 0 : i32
    %c0_i32_2 = arith.constant 0 : i32
    return %c0_i32, %c0_i32_0, %c0_i32_1 : i32, i32, i32
  }
  func.func @transform_5(%arg0: i32) -> (i32, i32, i32) {
    %c0_i32 = arith.constant 0 : i32
    %c0_i32_0 = arith.constant 0 : i32
    %c0_i32_1 = arith.constant 0 : i32
    return %arg0, %c0_i32, %c0_i32_0 : i32, i32, i32
  }
  func.func @transform_6(%arg0: i32) -> (i32, i32, i32) {
    %c0_i32 = arith.constant 0 : i32
    %c0_i32_0 = arith.constant 0 : i32
    %c0_i32_1 = arith.constant 0 : i32
    return %arg0, %c0_i32, %c0_i32_0 : i32, i32, i32
  }
}

</mosaic_0001>

<bundles_post_ra>
// kernel: tpu_custom_call.1
= control target key start
LH: loop header
LB: loop body
LE: loop exit
PB: predicated region body
PF: predicated region fallthrough
CT: control target
= control target key end

     0   :  { %12 = vsyncpa [#allocation3], 0  ;;  %s1808_s0 = inlined_call_operand.vmem [shape: f32[2,4,256], index: 0, kind: input, shape index: {}]   ;;  %s1809_s1 = inlined_call_operand.vmem [shape: f32[3,32,2], index: 1, kind: input, shape index: {}]   ;;  %s1810_s2 = inlined_call_operand.vmem [shape: f32[3,32,1], index: 2, kind: input, shape index: {}]   ;;  %s1811_s3 = inlined_call_operand.vmem [shape: f32[3,4,32], index: 3, kind: input, shape index: {}]   ;;  %s1812_s4 = inlined_call_operand.vmem [shape: f32[3,4,1], index: 4, kind: input, shape index: {}]   ;;  %s1813_s5 = inlined_call_operand.hbm [shape: f32[2,4,256], index: 5, kind: output, shape index: {0}]   ;;  %s1814_s6 = inlined_call_operand.hbm [shape: f32[2,1,128], index: 6, kind: output, shape index: {1}]  }
   0x1   :  { %14 = vsyncpa [#allocation3 + $0x1], 0 }
   0x2   :  { %15 = vsyncpa [#allocation5], 0 }
   0x3   :  { %17 = vsyncpa [#allocation5 + $0x1], 0  ;;  %s1469_s21 = smov 0   ;;  %s1471_s22 = smov 0  }
   0x4   :  { %s1473_s23 = smov 0   ;;  %s1475_s24 = smov 0  }
   0x5 LB: > { %s1490_s25 = sadd.s32 4294967295, %s1427_s24   ;;  %s1173_s26 = sadd.s32 4294967294, %s1427_s24   ;;  %s1427_s24 = sphi %s1475_s24, %s1820_s24   ;;  %s1423_s23 = sphi %s1473_s23, %s1819_s23   ;;  %s1419_s22 = sphi %s1471_s22, %s1818_s22   ;;  %s1415_s21 = sphi %s1469_s21, %s1817_s21  }
   0x6   : > { %s1494_s27 = sadd.s32 1, %s1427_s24   ;;  %s140_s28 = sadd.s32 1, %s1423_s23 }
   0x7   : > { %s137_s29 = ssub.s32 %s1427_s24, %s1494_s27  ;;  %p150_p0 = scmp.ne.s32.totalorder %s1423_s23, %s1419_s22 }
   0x8   : > { %p138_p1 = scmp.eq.s32.totalorder %s137_s29, 0  ;;  %p151_p2 = scmp.eq.s32.totalorder %s1490_s25, 1 }
   0x9   : > { %p156_p3 = scmp.ne.s32.totalorder %s1419_s22, %s1415_s21  ;;  %p157_p4 = scmp.eq.s32.totalorder %s1173_s26, 1 }
   0xa   : > { %s1505_s30 = scalar_select %p138_p1, %s1423_s23, %s140_s28  }
   0xb   : > { %p1507_p5 = por %p151_p2, %p150_p0  ;;  %p1511_p6 = por %p157_p4, %p156_p3 }
   0xc   : > { %p1176_p7 = scmp.ge.s32.totalorder %s1427_s24, 1  ;;  %p221_p8 = scmp.lt.s32.totalorder %s1427_s24, 3 }
   0xe   : > { %p222_p9 = pnand %p1176_p7, %p221_p8 }
   0xf   : > { %v265_v0 = vld [vmem:[%s1810_s2] sm:$0xff] (!%p222_p9)  ;;  %v1429_v2 = vmov (!%p222_p9), 0   ;;  %v266_v3 = vld [vmem:[%s1810_s2 + $0x8] sm:$0xff] (!%p222_p9)  ;;  %v264_v5 = vld [vmem:[%s1809_s1 + $0x18] sm:$0xff] (!%p222_p9)  ;;  %v1430_v6 = vmov (!%p222_p9), 1   ;;  %v1431_v10 = vmov (!%p222_p9), 0.0   ;;  %v292_v24 = vlaneseq (!%p222_p9) }
  0x10   : > { %225 = sbr.rel (%p222_p9) target bundleno = 1182 (0x49e), region = 40  ;;  %v261_v1 = vld [vmem:[%s1809_s1] sm:$0xff] (!%p222_p9)  ;;  %1290 = vset.pattern.permute.xlu1 (!%p222_p9), %v1429_v2  ;;  %1289 = vset.pattern.permute.xlu0 (!%p222_p9), %v1429_v2  ;;  %v262_v4 = vld [vmem:[%s1809_s1 + $0x8] sm:$0xff] (!%p222_p9)  ;;  %v263_v7 = vld [vmem:[%s1809_s1 + $0x10] sm:$0xff] (!%p222_p9)  ;;  %p255_p10 = scmp.lt.s32.totalorder (!%p222_p9), %s1490_s25, 1  ;;  %vm409_vm0 = vcmask (!%p222_p9), 261120  }
  0x11   : > { %320 = vperm.xlu1 (!%p222_p9), %1290, %v265_v0   ;;  %273 = vperm.xlu0 (!%p222_p9), %1289, %v261_v1   ;;  %v267_v8 = vld [vmem:[%s1810_s2 + $0x10] sm:$0xff] (!%p222_p9)  ;;  %v268_v9 = vld [vmem:[%s1810_s2 + $0x18] sm:$0xff] (!%p222_p9)  ;;  %v270_v11 = vld [vmem:[%s1812_s4] sm:$0xf] (!%p222_p9)  ;;  %v1612_v25 = vshrl.u32 (!%p222_p9), %v292_v24, 7  ;;  %vm503_vm1 = vcmask (!%p222_p9), 1041408  }
  0x12   : > { %477 = vmatprep.mubr.f32.mxu0 (!%p222_p9), %v1431_v10  ;;  %736 = vmatprep.mubr.f32.mxu1 (!%p222_p9), %v1431_v10  ;;  %v1181_v12 = vld [vmem:[%s1809_s1 + $0x20] sm:$0xff] (!%p222_p9)  ;;  %v1182_v13 = vld [vmem:[%s1809_s1 + $0x28] sm:$0xff] (!%p222_p9)  ;;  %v1187_v16 = vld [vmem:[%s1810_s2 + $0x30] sm:$0xff] (!%p222_p9)  ;;  %s1728_s14 = sand.u32 (!%p222_p9), 1, %s1419_s22   ;;  %s1211_s17 = sshll.u32 (!%p222_p9), %s1490_s25, 7 }
  0x13   : > { %v1186_v14 = vld [vmem:[%s1810_s2 + $0x28] sm:$0xff] (!%p222_p9)  ;;  %v1185_v15 = vld [vmem:[%s1810_s2 + $0x20] sm:$0xff] (!%p222_p9)  ;;  %v1183_v17 = vld [vmem:[%s1809_s1 + $0x30] sm:$0xff] (!%p222_p9)  ;;  %v1618_v26 = vsub.s32 (!%p222_p9), 0, %v1612_v25  ;;  %v298_v27 = vsub.s32 (!%p222_p9), 4, %v1612_v25  ;;  %v1624_v29 = vsub.s32 (!%p222_p9), 1, %v1612_v25 }
  0x14   : > { %v1184_v18 = vld [vmem:[%s1809_s1 + $0x38] sm:$0xff] (!%p222_p9)  ;;  %v1581_v19 = vld [vmem:[%s1809_s1 + $0x48] sm:$0xff] (!%p222_p9)  ;;  %v1597_v22 = vld [vmem:[%s1809_s1 + $0x40] sm:$0xff] (!%p222_p9)  ;;  %v368_v30 = vsub.s32 (!%p222_p9), 5, %v1612_v25  ;;  %s1177_s15 = sshll.u32 (!%p222_p9), %s1728_s14, 3  ;;  %s1432_s9 = smov (!%p222_p9), [#allocation2]  }
  0x15   : > { %325 = vperm.xlu1 (!%p222_p9), %1290, %v266_v3   ;;  %278 = vperm.xlu0 (!%p222_p9), %1289, %v262_v4   ;;  %v1188_v20 = vld [vmem:[%s1810_s2 + $0x38] sm:$0xff] (!%p222_p9)  ;;  %v1605_v23 = vld [vmem:[%s1809_s1 + $0x50] sm:$0xff] (!%p222_p9)  ;;  %s248_s16 = scalar_lea.vmem (!%p222_p9), [#allocation2], %s1177_s15 }
  0x16   : > { %v1591_v21 = vld [vmem:[%s1809_s1 + $0x58] sm:$0xff] (!%p222_p9)  ;;  %s1073_s18 = sshll.u32 (!%p222_p9), %s248_s16, 4  ;;  %s1074_s18 = int_to_ptr.vmem [resolvable:$true] %s1073_s18 }
  0x17   : > { %s256_s26 = scalar_select %p255_p10, %s1490_s25, 1 }
  0x18   : > { %s1333_s29 = scalar_lea.vmem %s1074_s18, 128 }
  0x19   : > { %1291 = vset.pattern.permute.xlu1 %v1430_v6  ;;  %288 = vperm.xlu0 %1289, %v264_v5   ;;  %s1210_s28 = sshll.u32 %s256_s26, 3  ;;  %s1740_s26 = scalar_lea.hbm %s1813_s5, %s1211_s17 }
  0x1a   : > { %351 = vperm.xlu1 %1291, %v262_v4   ;;  %s259_s10 = scalar_lea.vmem %s1808_s0, %s1210_s28  ;;  %s1055_s28 = scalar_lea.sflag [#allocation3], %s1728_s14 }
  0x1b   : > { %v1621_v28 = vld [vmem:[%s259_s10] sm:$0xff]  ;;  %p1334_p11 = scmp.ne.s32.totalorder %s1074_s18, %s1333_s29  ;;  %s1337_s10 = sshll.u32 %s1432_s9, 4  ;;  %s1338_s10 = int_to_ptr.vmem [resolvable:$false] %s1337_s10 }
  0x1c   : > { %v295_v33 = vrot.slane %v1621_v28, %v1618_v26  ;;  %v299_v34 = vrot.slane %v1621_v28, %v298_v27  ;;  %v365_v35 = vrot.slane %v1621_v28, %v1624_v29  ;;  %v369_v36 = vrot.slane %v1621_v28, %v368_v30  ;;  %s1339_s11 = scalar_lea.vmem %s1338_s10, 256  ;;  %p1340_p0 = scmp.lt.s32.totalorder %s1074_s18, %s1338_s10 }
  0x1d   : > { %1293 = vset.pattern.permute.xlu0 %v1430_v6  ;;  %p1335_p12 = pnand %p1334_p11, %p1507_p5  ;;  %p1341_p1 = scmp.lt.s32.totalorder %s1339_s11, %s1333_s29 }
  0x1e   : > { %1292 = vset.pattern.permute.xlu1 %v1429_v2  ;;  %347 = vperm.xlu0 %1293, %v261_v1   ;;  %v305_v39 = vrot.slane %v295_v33, %v1618_v26  ;;  %v309_v40 = vrot.slane %v299_v34, %v1618_v26  ;;  %v375_v41 = vrot.slane %v365_v35, %v1624_v29 }
  0x1f   : > { %283 = vperm.xlu1 %1292, %v263_v7   ;;  %v379_v42 = vrot.slane %v369_v36, %v1624_v29  ;;  %p1336_p13 = pneg %p1335_p12  ;;  %p1342_p2 = por %p1341_p1, %p1340_p0 }
  0x21   : > { %p1343_p3 = pnand %p1342_p2, %p1336_p13 }
  0x22   : > { %355 = vperm.xlu0 %1293, %v263_v7  }
  0x23   : > { %330 = vperm.xlu1 %1292, %v267_v8  }
  0x26   : > { %1296 = vset.pattern.permute.xlu0 %v1429_v2 }
  0x27   : > { %335 = vperm.xlu1 %1292, %v268_v9   ;;  %533 = vperm.xlu0 %1296, %v1181_v12  }
  0x2b   : > { %1294 = vset.pattern.permute.xlu1 %v1430_v6  ;;  %585 = vperm.xlu0 %1296, %v1186_v14  }
  0x2c   : > { %359 = vperm.xlu1 %1294, %v264_v5  }
  0x2f   : > { %590 = vperm.xlu0 %1296, %v1187_v16  }
  0x30   : > { %1295 = vset.pattern.permute.xlu1 %v1429_v2 }
  0x31   : > { %406 = vperm.xlu1 %1295, %v270_v11  }
  0x33   : > { %1299 = vset.pattern.permute.xlu0 %v1430_v6 }
  0x34   : > { %611 = vperm.xlu0 %1299, %v1182_v13  }
  0x35   : > { %538 = vperm.xlu1 %1295, %v1182_v13  }
  0x38   : > { %619 = vperm.xlu0 %1299, %v1184_v18  }
  0x39   : > { %580 = vperm.xlu1 %1295, %v1185_v15  }
  0x3c   : > { %1302 = vset.pattern.permute.xlu0 %v1429_v2 }
  0x3d   : > { %1297 = vset.pattern.permute.xlu1 %v1430_v6  ;;  %797 = vperm.xlu0 %1302, %v1581_v19  }
  0x3e   : > { %607 = vperm.xlu1 %1297, %v1181_v12  }
  0x41   : > { %807 = vperm.xlu0 %1302, %v1591_v21  }
  0x42   : > { %1298 = vset.pattern.permute.xlu1 %v1429_v2 }
  0x43   : > { %543 = vperm.xlu1 %1298, %v1183_v17  }
  0x45   : > { %1305 = vset.pattern.permute.xlu0 %v1430_v6 }
  0x46   : > { %866 = vperm.xlu0 %1305, %v1597_v22  }
  0x47   : > { %548 = vperm.xlu1 %1298, %v1184_v18  }
  0x4a   : > { %874 = vperm.xlu0 %1305, %v1605_v23  }
  0x4b   : > { %595 = vperm.xlu1 %1298, %v1188_v20  }
  0x4e   : > { %1308 = vset.pattern.permute.xlu0 %v1429_v2 }
  0x4f   : > { %1300 = vset.pattern.permute.xlu1 %v1430_v6 }
  0x50   : > { %615 = vperm.xlu1 %1300, %v1183_v17  }
  0x54   : > { %1301 = vset.pattern.permute.xlu1 %v1429_v2 }
  0x90   : > { %v321_v31 = vpop.permute.xlu1 %320  ;;  %v274_v32 = vpop.permute.xlu0 %273 }
  0x91   : > { %v310_v46 = vmul.f32 %v305_v39, %v274_v32  ;;  %v311_v47 = vmul.f32 %v309_v40, %v274_v32 }
  0x93   : > { %v338_v53 = vadd.f32 %v321_v31, %v310_v46  ;;  %v339_v54 = vadd.f32 %v321_v31, %v311_v47 }
  0x94   : > { %v326_v37 = vpop.permute.xlu1 %325  ;;  %v279_v38 = vpop.permute.xlu0 %278 }
  0x95   : > { %v312_v43 = vmul.f32 %v305_v39, %v279_v38  ;;  %v313_v44 = vmul.f32 %v309_v40, %v279_v38 }
  0x97   : > { %v340_v51 = vadd.f32 %v326_v37, %v312_v43  ;;  %v341_v52 = vadd.f32 %v326_v37, %v313_v44 }
  0x98   : > { %v289_v45 = vpop.permute.xlu0 %288 }
  0x99   : > { %v352_v48 = vpop.permute.xlu1 %351  ;;  %v316_v17 = vmul.f32 %v305_v39, %v289_v45  ;;  %v317_v18 = vmul.f32 %v309_v40, %v289_v45 }
  0x9a   : > { %v382_v49 = vmul.f32 %v375_v41, %v352_v48  ;;  %v383_v50 = vmul.f32 %v379_v42, %v352_v48 }
  0x9c   : > { %v390_v56 = vadd.f32 %v382_v49, %v340_v51  ;;  %v391_v60 = vadd.f32 %v383_v50, %v341_v52 }
  0x9d   : > { %v348_v55 = vpop.permute.xlu0 %347 }
  0x9e   : > { %v380_v57 = vmul.f32 %v375_v41, %v348_v55  ;;  %v381_v58 = vmul.f32 %v379_v42, %v348_v55  ;;  %v284_v59 = vpop.permute.xlu1 %283  ;;  %v399_v1 = vmax.f32 %v391_v60, 0.0  ;;  %v398_v4 = vmax.f32 %v390_v56, 0.0 }
  0x9f   : > { %v314_v9 = vmul.f32 %v305_v39, %v284_v59  ;;  %v315_v11 = vmul.f32 %v309_v40, %v284_v59  ;;  %v269_v39 = vld [vmem:[%s1811_s3] sm:$0xf]  ;;  %v1190_v40 = vld [vmem:[%s1812_s4 + $0x4] sm:$0xf] }
  0xa0   : > { %v388_v61 = vadd.f32 %v380_v57, %v338_v53  ;;  %v389_v62 = vadd.f32 %v381_v58, %v339_v54  ;;  %666 = vperm.xlu1 %1301, %v1190_v40  }
  0xa1   : > { %v356_v5 = vpop.permute.xlu0 %355 }
  0xa2   : > { %v331_v63 = vpop.permute.xlu1 %330  ;;  %v397_v0 = vmax.f32 %v389_v62, 0.0  ;;  %v396_v3 = vmax.f32 %v388_v61, 0.0  ;;  %v384_v15 = vmul.f32 %v375_v41, %v356_v5  ;;  %v385_v16 = vmul.f32 %v379_v42, %v356_v5 }
  0xa3   : > { %v342_v13 = vadd.f32 %v331_v63, %v314_v9  ;;  %v343_v14 = vadd.f32 %v331_v63, %v315_v11  ;;  %v628_v9 = vsub.s32 7, %v1612_v25  ;;  %v554_v11 = vsub.s32 2, %v1612_v25 }
  0xa4   : > { %v1212_v7 = vpack.c.bf16 %v399_v1, %v397_v0  ;;  %v1214_v8 = vpack.c.bf16 %v398_v4, %v396_v3  ;;  %792 = vperm.xlu1 %1301, %v1597_v22  }
  0xa5   : > { %v392_v20 = vadd.f32 %v384_v15, %v342_v13  ;;  %v393_v24 = vadd.f32 %v385_v16, %v343_v14 }
  0xa6   : > { %v336_v12 = vpop.permute.xlu1 %335  ;;  %1213 = vmatprep.subr.bf16.mxu0 %v1212_v7  ;;  %v534_v62 = vpop.permute.xlu0 %533  ;;  %v624_v7 = vsub.s32 3, %v1612_v25 }
  0xa7   : > { %1215 = vmatpush1.bf16.msra.mxu0 %v1214_v8  ;;  %v344_v32 = vadd.f32 %v336_v12, %v316_v17  ;;  %v345_v33 = vadd.f32 %v336_v12, %v317_v18  ;;  %v400_v38 = vmax.f32 %v392_v20, 0.0  ;;  %v401_v43 = vmax.f32 %v393_v24, 0.0 }
  0xa8   : > { %v558_v12 = vsub.s32 6, %v1612_v25 }
  0xaa   : > { %v586_v1 = vpop.permute.xlu0 %585 }
  0xab   : > { %v360_v31 = vpop.permute.xlu1 %359 }
  0xac   : > { %v386_v34 = vmul.f32 %v375_v41, %v360_v31  ;;  %v387_v35 = vmul.f32 %v379_v42, %v360_v31  ;;  %v1197_v41 = vld [vmem:[%s1810_s2 + $0x40] sm:$0xff]  ;;  %v1198_v42 = vld [vmem:[%s1810_s2 + $0x48] sm:$0xff]  ;;  %v1199_v31 = vld [vmem:[%s1810_s2 + $0x50] sm:$0xff] }
  0xad   : > { %839 = vperm.xlu1 %1301, %v1197_v41  }
  0xae   : > { %v394_v36 = vadd.f32 %v386_v34, %v344_v32  ;;  %v395_v37 = vadd.f32 %v387_v35, %v345_v33  ;;  %v591_v14 = vpop.permute.xlu0 %590 }
  0xb0   : > { %v402_v44 = vmax.f32 %v394_v36, 0.0  ;;  %v403_v46 = vmax.f32 %v395_v37, 0.0 }
  0xb1   : > { %844 = vperm.xlu1 %1301, %v1198_v42  }
  0xb2   : > { %v1216_v47 = vpack.c.bf16 %v403_v46, %v401_v43  ;;  %v1218_v48 = vpack.c.bf16 %v402_v44, %v400_v38 }
  0xb3   : > { %v612_v24 = vpop.permute.xlu0 %611 }
  0xb4   : > { %1217 = vmatprep.subr.bf16.mxu0 %v1216_v47 }
  0xb5   : > { %1219 = vmatpush1.bf16.msra.mxu0 %v1218_v48  ;;  %1303 = vset.pattern.permute.xlu1 %v1430_v6 }
  0xb6   : > { %870 = vperm.xlu1 %1303, %v1581_v19  }
  0xb8   : > { %1180 = vmatmul.mubr.msk.f32.vlgmr.msra.gmra.mrb[0].mxu0 %vm409_vm0, %v269_v39 }
  0xb9   : > { %995 = vmatprep.mubr.f32.mxu0 %v1431_v10  ;;  %v407_v10 = vpop.permute.xlu1 %406 }
  0xba   : > { %1304 = vset.pattern.permute.xlu1 %v1429_v2 }
  0xbb   : > { %802 = vperm.xlu1 %1304, %v1605_v23  }
  0xbd   : > { %v539_v52 = vpop.permute.xlu1 %538 }
  0xbf   : > { %849 = vperm.xlu1 %1304, %v1199_v31  }
  0xc1   : > { %v581_v59 = vpop.permute.xlu1 %580 }
  0xc5   : > { %v608_v61 = vpop.permute.xlu1 %607 }
  0xc9   : > { %v544_v0 = vpop.permute.xlu1 %543 }
  0xcd   : > { %v549_v13 = vpop.permute.xlu1 %548 }
  0xd1   : > { %v596_v36 = vpop.permute.xlu1 %595 }
 0x18b   : > { %v479_v22 = vpop.f32.mrb[0].mxu0 }
 0x18c   : > { %v480_v45 = vadd.f32 %v479_v22, %v407_v10  ;;  %v481_v49 = vpop.f32.mrb[1].mxu0  ;;  %v616_v22 = vpop.permute.xlu1 %615 }
 0x18d   : > { %v482_v50 = vadd.f32 %v481_v49, %v407_v10 }
 0x18e   : > { %1309 = vtanh.f32 %v480_v45 }
 0x18f   : > { %1311 = vtanh.f32 %v482_v50  ;;  %v500_v51 = vcombine.low %v480_v45, %v482_v50  ;;  %v620_v45 = vpop.permute.xlu0 %619 }
 0x198   : > { %v1310_v53 = vpop.eup %1309 }
 0x199   : > { %v1312_v54 = vpop.eup %1311  ;;  %v486_v55 = vmul.f32 2.0, %v1310_v53 }
 0x19a   : > { %v487_v56 = vmul.f32 2.0, %v1312_v54 }
 0x19b   : > { %v488_v57 = vmul.f32 1.442695, %v486_v55  ;;  %v504_v19 = vsel %vm503_vm1, %v486_v55, 0.0 }
 0x19c   : > { %v490_v58 = vmul.f32 1.442695, %v487_v56  ;;  %v505_v23 = vsel %vm503_vm1, %v487_v56, 0.0 }
 0x19d   : > { %1313 = vpow2.f32 %v488_v57  ;;  %v506_v60 = vadd.f32 %v505_v23, %v504_v19  ;;  %v1200_v19 = vld [vmem:[%s1810_s2 + $0x58] sm:$0xff] }
 0x19e   : > { %1315 = vpow2.f32 %v490_v58  ;;  %854 = vperm.xlu1 %1304, %v1200_v19  }
 0x19f   : > { %507 = vadd.xlane.f32.xlu0 %v506_v60 }
 0x1a2   : > { %1306 = vset.pattern.permute.xlu1 %v1430_v6  ;;  %v1202_v6 = vld [vmem:[%s1812_s4 + $0x8] sm:$0xf] }
 0x1a3   : > { %878 = vperm.xlu1 %1306, %v1591_v21   ;;  %v798_v21 = vpop.permute.xlu0 %797 }
 0x1a7   : > { %v1314_v63 = vpop.eup %1313  ;;  %1307 = vset.pattern.permute.xlu1 %v1429_v2  ;;  %v1689_v31 = vpop.permute.xlu0 %807 }
 0x1a8   : > { %v1316_v3 = vpop.eup %1315  ;;  %925 = vperm.xlu1 %1307, %v1202_v6  }
 0x1a9   : > { %v494_v4 = vcombine.low %v1314_v63, %v1316_v3 }
 0x1ab   : > { %v495_v5 = vrot.slane %v494_v4, 6 }
 0x1ad   : > { %v497_v8 = vmul.f32 %v495_v5, %v1621_v28 }
 0x1af   : > { %v1667_v15 = vadd.f32 %v500_v51, %v497_v8 }
 0x1b1   : > { %v625_v16 = vrot.slane %v1667_v15, %v624_v7  ;;  %v629_v17 = vrot.slane %v1667_v15, %v628_v9  ;;  %v555_v18 = vrot.slane %v1667_v15, %v554_v11  ;;  %v559_v20 = vrot.slane %v1667_v15, %v558_v12 }
 0x1b3   : > { %v635_v32 = vrot.slane %v625_v16, %v624_v7  ;;  %v639_v33 = vrot.slane %v629_v17, %v624_v7  ;;  %v565_v34 = vrot.slane %v555_v18, %v554_v11  ;;  %v569_v35 = vrot.slane %v559_v20, %v554_v11 }
 0x1b5   : > { %v640_v37 = vmul.f32 %v635_v32, %v608_v61  ;;  %v641_v38 = vmul.f32 %v639_v33, %v608_v61  ;;  %v570_v43 = vmul.f32 %v565_v34, %v534_v62  ;;  %v571_v44 = vmul.f32 %v569_v35, %v534_v62 }
 0x1b6   : > { %v574_v46 = vmul.f32 %v565_v34, %v544_v0  ;;  %v575_v47 = vmul.f32 %v569_v35, %v544_v0  ;;  %v572_v48 = vmul.f32 %v565_v34, %v539_v52  ;;  %v573_v39 = vmul.f32 %v569_v35, %v539_v52 }
 0x1b7   : > { %v598_v40 = vadd.f32 %v581_v59, %v570_v43  ;;  %v599_v41 = vadd.f32 %v581_v59, %v571_v44  ;;  %v576_v42 = vmul.f32 %v565_v34, %v549_v13  ;;  %v577_v10 = vmul.f32 %v569_v35, %v549_v13  ;;  %v667_v44 = vpop.permute.xlu1 %666 }
 0x1b8   : > { %v600_v49 = vadd.f32 %v586_v1, %v572_v48  ;;  %v601_v50 = vadd.f32 %v586_v1, %v573_v39  ;;  %v602_v51 = vadd.f32 %v591_v14, %v574_v46  ;;  %v603_v53 = vadd.f32 %v591_v14, %v575_v47 }
 0x1b9   : > { %v604_v54 = vadd.f32 %v596_v36, %v576_v42  ;;  %v605_v55 = vadd.f32 %v596_v36, %v577_v10  ;;  %v642_v56 = vmul.f32 %v635_v32, %v612_v24  ;;  %v643_v57 = vmul.f32 %v639_v33, %v612_v24  ;;  %v1189_v24 = vld [vmem:[%s1811_s3 + $0x4] sm:$0xf] }
 0x1ba   : > { %v644_v58 = vmul.f32 %v635_v32, %v616_v22  ;;  %v645_v52 = vmul.f32 %v639_v33, %v616_v22  ;;  %v646_v23 = vmul.f32 %v635_v32, %v620_v45  ;;  %v647_v59 = vmul.f32 %v639_v33, %v620_v45  ;;  %v1691_v32 = vpop.permute.xlu0 %866 }
 0x1bb   : > { %v650_v60 = vadd.f32 %v642_v56, %v600_v49  ;;  %v649_v61 = vadd.f32 %v641_v38, %v599_v41  ;;  %v651_v62 = vadd.f32 %v643_v57, %v601_v50  ;;  %v648_v63 = vadd.f32 %v640_v37, %v598_v40  ;;  %v793_v41 = vpop.permute.xlu1 %792 }
 0x1bc   : > { %v652_v0 = vadd.f32 %v644_v58, %v602_v51  ;;  %v653_v1 = vadd.f32 %v645_v52, %v603_v53  ;;  %v654_v3 = vadd.f32 %v646_v23, %v604_v54  ;;  %v655_v4 = vadd.f32 %v647_v59, %v605_v55 }
 0x1bd   : > { %v657_v5 = vmax.f32 %v649_v61, 0.0  ;;  %v659_v7 = vmax.f32 %v651_v62, 0.0  ;;  %v656_v8 = vmax.f32 %v648_v63, 0.0  ;;  %v658_v9 = vmax.f32 %v650_v60, 0.0 }
 0x1be   : > { %v661_v11 = vmax.f32 %v653_v1, 0.0  ;;  %v663_v12 = vmax.f32 %v655_v4, 0.0  ;;  %v660_v16 = vmax.f32 %v652_v0, 0.0  ;;  %v662_v17 = vmax.f32 %v654_v3, 0.0  ;;  %v1693_v33 = vpop.permute.xlu0 %874 }
 0x1bf   : > { %v1220_v13 = vpack.c.bf16 %v659_v7, %v657_v5  ;;  %v1222_v14 = vpack.c.bf16 %v658_v9, %v656_v8  ;;  %v840_v10 = vpop.permute.xlu1 %839 }
 0x1c0   : > { %v1224_v18 = vpack.c.bf16 %v663_v12, %v661_v11  ;;  %v1226_v20 = vpack.c.bf16 %v662_v17, %v660_v16 }
 0x1c1   : > { %1221 = vmatprep.subr.bf16.mxu1 %v1220_v13 }
 0x1c2   : > { %1223 = vmatpush1.bf16.msra.mxu1 %v1222_v14 }
 0x1c3   : > { %1225 = vmatprep.subr.bf16.mxu1 %v1224_v18  ;;  %v845_v56 = vpop.permute.xlu1 %844 }
 0x1c6   : > { %1227 = vmatpush1.bf16.msra.mxu1 %v1226_v20 }
 0x1c7   : > { %v871_v57 = vpop.permute.xlu1 %870 }
 0x1c9   : > { %1191 = vmatmul.mubr.msk.f32.vlgmr.msra.gmra.mrb[0].mxu1 %vm409_vm0, %v1189_v24 }
 0x1cb   : > { %v803_v52 = vpop.permute.xlu1 %802 }
 0x1cf   : > { %v850_v62 = vpop.permute.xlu1 %849 }
 0x21d   : > { %v855_v11 = vpop.permute.xlu1 %854 }
 0x222   : > { %v879_v20 = vpop.permute.xlu1 %878 }
 0x22c   : > { %v508_v2 = vpop.xlane.xlu0 %507 }
 0x22d   : > { %v509_v34 = vrot.slane %v508_v2, 4 }
 0x22f   : > { %v510_v35 = vadd.f32 %v509_v34, %v508_v2 }
 0x231   : > { %v511_v36 = vrot.slane %v510_v35, 2 }
 0x233   : > { %v512_v37 = vadd.f32 %v511_v36, %v510_v35 }
 0x235   : > { %v513_v38 = vrot.slane %v512_v37, 1 }
 0x237   : > { %v514_v43 = vadd.f32 %v513_v38, %v512_v37 }
 0x239   : > { %1236 = vpush %v514_v43 }
 0x29c   : > { %v738_v46 = vpop.f32.mrb[0].mxu1 }
 0x29d   : > { %v739_v47 = vadd.f32 %v738_v46, %v667_v44  ;;  %v740_v48 = vpop.f32.mrb[1].mxu1 }
 0x29e   : > { %v741_v39 = vadd.f32 %v740_v48, %v667_v44 }
 0x29f   : > { %1317 = vtanh.f32 %v739_v47 }
 0x2a0   : > { %1319 = vtanh.f32 %v741_v39  ;;  %v758_v40 = vcombine.low %v739_v47, %v741_v39 }
 0x2a2   : > { %v1192_v60 = vrot.slane %v758_v40, 10 }
 0x2a9   : > { %v1318_v42 = vpop.eup %1317 }
 0x2aa   : > { %v1320_v22 = vpop.eup %1319  ;;  %v745_v45 = vmul.f32 2.0, %v1318_v42 }
 0x2ab   : > { %v746_v49 = vmul.f32 2.0, %v1320_v22 }
 0x2ac   : > { %v747_v50 = vmul.f32 1.442695, %v745_v45  ;;  %v763_v51 = vsel %vm503_vm1, %v745_v45, 0.0 }
 0x2ad   : > { %v749_v53 = vmul.f32 1.442695, %v746_v49  ;;  %v764_v54 = vsel %vm503_vm1, %v746_v49, 0.0 }
 0x2ae   : > { %1321 = vpow2.f32 %v747_v50  ;;  %v765_v55 = vadd.f32 %v764_v54, %v763_v51 }
 0x2af   : > { %1323 = vpow2.f32 %v749_v53 }
 0x2b0   : > { %766 = vadd.xlane.f32.xlu1 %v765_v55 }
 0x2b8   : > { %v1322_v19 = vpop.eup %1321 }
 0x2b9   : > { %v1324_v58 = vpop.eup %1323 }
 0x2ba   : > { %v753_v23 = vcombine.low %v1322_v19, %v1324_v58  ;;  %v926_v19 = vpop.permute.xlu1 %925 }
 0x2bc   : > { %v755_v59 = vmul.f32 %v753_v23, %v1621_v28 }
 0x2be   : > { %v1698_v61 = vadd.f32 %v1192_v60, %v755_v59 }
 0x2c0   : > { %v814_v63 = vrot.slane %v1698_v61, %v1618_v26  ;;  %v818_v0 = vrot.slane %v1698_v61, %v298_v27  ;;  %v884_v1 = vrot.slane %v1698_v61, %v1624_v29  ;;  %v888_v28 = vrot.slane %v1698_v61, %v368_v30 }
 0x2c2   : > { %v824_v3 = vrot.slane %v814_v63, %v1618_v26  ;;  %v828_v4 = vrot.slane %v818_v0, %v1618_v26  ;;  %v894_v9 = vrot.slane %v884_v1, %v1624_v29  ;;  %v898_v12 = vrot.slane %v888_v28, %v1624_v29 }
 0x2c4   : > { %v829_v5 = vmul.f32 %v824_v3, %v793_v41  ;;  %v831_v7 = vmul.f32 %v824_v3, %v798_v21  ;;  %v832_v8 = vmul.f32 %v828_v4, %v798_v21  ;;  %v834_v27 = vmul.f32 %v828_v4, %v803_v52 }
 0x2c5   : > { %v836_v17 = vmul.f32 %v828_v4, %v1689_v31  ;;  %v899_v26 = vmul.f32 %v894_v9, %v1691_v32  ;;  %v901_v18 = vmul.f32 %v894_v9, %v871_v57  ;;  %v833_v25 = vmul.f32 %v824_v3, %v803_v52 }
 0x2c6   : > { %v857_v13 = vadd.f32 %v840_v10, %v829_v5  ;;  %v859_v14 = vadd.f32 %v845_v56, %v831_v7  ;;  %v860_v16 = vadd.f32 %v845_v56, %v832_v8  ;;  %v835_v30 = vmul.f32 %v824_v3, %v1689_v31 }
 0x2c7   : > { %v902_v24 = vmul.f32 %v898_v12, %v871_v57  ;;  %v862_v6 = vadd.f32 %v850_v62, %v834_v27  ;;  %v864_v21 = vadd.f32 %v855_v11, %v836_v17  ;;  %v904_v29 = vmul.f32 %v898_v12, %v1693_v33 }
 0x2c8   : > { %v907_v2 = vadd.f32 %v899_v26, %v857_v13  ;;  %v909_v34 = vadd.f32 %v901_v18, %v859_v14  ;;  %v906_v36 = vmul.f32 %v898_v12, %v879_v20  ;;  %v830_v37 = vmul.f32 %v828_v4, %v793_v41 }
 0x2c9   : > { %v910_v35 = vadd.f32 %v902_v24, %v860_v16  ;;  %v861_v38 = vadd.f32 %v850_v62, %v833_v25  ;;  %v863_v43 = vadd.f32 %v855_v11, %v835_v30  ;;  %v912_v44 = vadd.f32 %v904_v29, %v862_v6 }
 0x2ca   : > { %v914_v46 = vadd.f32 %v906_v36, %v864_v21  ;;  %v858_v47 = vadd.f32 %v840_v10, %v830_v37  ;;  %v900_v48 = vmul.f32 %v898_v12, %v1691_v32  ;;  %v915_v39 = vmax.f32 %v907_v2, 0.0 }
 0x2cb   : > { %v917_v31 = vmax.f32 %v909_v34, 0.0  ;;  %v903_v40 = vmul.f32 %v894_v9, %v1693_v33  ;;  %v905_v42 = vmul.f32 %v894_v9, %v879_v20  ;;  %v918_v22 = vmax.f32 %v910_v35, 0.0  ;;  %v1201_v33 = vld [vmem:[%s1811_s3 + $0x8] sm:$0xf] }
 0x2cc   : > { %v908_v45 = vadd.f32 %v900_v48, %v858_v47  ;;  %v920_v51 = vmax.f32 %v912_v44, 0.0  ;;  %v922_v53 = vmax.f32 %v914_v46, 0.0  ;;  %v1040_v20 = vcombine.high %v1698_v61, %v1698_v61 }
 0x2cd   : > { %v911_v49 = vadd.f32 %v903_v40, %v861_v38  ;;  %v913_v50 = vadd.f32 %v905_v42, %v863_v43  ;;  %v1230_v41 = vpack.c.bf16 %v917_v31, %v915_v39  ;;  %v1041_v21 = vrot.slane %v1698_v61, 6 }
 0x2ce   : > { %v916_v54 = vmax.f32 %v908_v45, 0.0  ;;  %v1232_v10 = vpack.c.bf16 %v922_v53, %v920_v51  ;;  %v1042_v34 = vrot.slane %v1040_v20, 6 }
 0x2cf   : > { %v919_v56 = vmax.f32 %v911_v49, 0.0  ;;  %v921_v57 = vmax.f32 %v913_v50, 0.0 }
 0x2d0   : > { %v1228_v55 = vpack.c.bf16 %v918_v22, %v916_v54 }
 0x2d1   : > { %v1234_v32 = vpack.c.bf16 %v921_v57, %v919_v56 }
 0x2d2   : > { %1229 = vmatprep.subr.bf16.mxu0 %v1228_v55 }
 0x2d3   : > { %1231 = vmatpush1.bf16.msra.mxu0 %v1230_v41 }
 0x2d4   : > { %1233 = vmatprep.subr.bf16.mxu0 %v1232_v10 }
 0x2d7   : > { %1235 = vmatpush1.bf16.msra.mxu0 %v1234_v32 }
 0x2da   : > { %1203 = vmatmul.mubr.msk.f32.vlgmr.msra.gmra.mrb[2].mxu0 %vm409_vm0, %v1201_v33 }
 0x33d   : > { %v767_v58 = vpop.xlane.xlu1 %766 }
 0x33e   : > { %v768_v52 = vrot.slane %v767_v58, 4 }
 0x340   : > { %v769_v23 = vadd.f32 %v768_v52, %v767_v58 }
 0x342   : > { %v770_v59 = vrot.slane %v769_v23, 2 }
 0x344   : > { %v771_v60 = vadd.f32 %v770_v59, %v769_v23 }
 0x346   : > { %v772_v62 = vrot.slane %v771_v60, 1 }
 0x348   : > { %v773_v63 = vadd.f32 %v772_v62, %v771_v60 }
 0x34a   : > { %1238 = vpush %v773_v63 }
 0x3ad   : > { %v997_v0 = vpop.f32.mrb[2].mxu0 }
 0x3ae   : > { %v998_v1 = vadd.f32 %v997_v0, %v926_v19  ;;  %v999_v3 = vpop.f32.mrb[3].mxu0 }
 0x3af   : > { %v1000_v4 = vadd.f32 %v999_v3, %v926_v19 }
 0x3b0   : > { %1325 = vtanh.f32 %v998_v1 }
 0x3b1   : > { %1327 = vtanh.f32 %v1000_v4  ;;  %v1018_v28 = vcombine.low %v998_v1, %v1000_v4 }
 0x3ba   : > { %v1326_v5 = vpop.eup %1325 }
 0x3bb   : > { %v1328_v7 = vpop.eup %1327  ;;  %v1004_v8 = vmul.f32 2.0, %v1326_v5 }
 0x3bc   : > { %v1005_v9 = vmul.f32 2.0, %v1328_v7 }
 0x3bd   : > { %v1006_v11 = vmul.f32 1.442695, %v1004_v8  ;;  %v1021_v12 = vsel %vm503_vm1, %v1004_v8, 0.0 }
 0x3be   : > { %v1008_v27 = vmul.f32 1.442695, %v1005_v9  ;;  %v1022_v13 = vsel %vm503_vm1, %v1005_v9, 0.0 }
 0x3bf   : > { %1329 = vpow2.f32 %v1006_v11  ;;  %v1023_v14 = vadd.f32 %v1022_v13, %v1021_v12 }
 0x3c0   : > { %1331 = vpow2.f32 %v1008_v27 }
 0x3c1   : > { %1024 = vadd.xlane.f32.xlu0 %v1023_v14 }
 0x3c9   : > { %v1330_v16 = vpop.eup %1329 }
 0x3ca   : > { %v1332_v17 = vpop.eup %1331 }
 0x3cb   : > { %v1012_v26 = vcombine.low %v1330_v16, %v1332_v17 }
 0x3cd   : > { %v1013_v18 = vrot.slane %v1012_v26, 6 }
 0x3cf   : > { %v1015_v25 = vmul.f32 %v1013_v18, %v1667_v15 }
 0x3d1   : > { %v1020_v30 = vadd.f32 %v1018_v28, %v1015_v25 }
 0x3d3   : > { %v1035_v24 = vcombine.high %v1020_v30, %v1020_v30  ;;  %v1036_v6 = vrot.slane %v1020_v30, 2 }
 0x3d5   : > { %v1037_v2 = vrot.slane %v1035_v24, 2  ;;  %v1045_v35 = vsel %vm503_vm1, %v1036_v6, %v1041_v21 }
 0x3d7   : > { %v1046_v15 = vsel %vm503_vm1, %v1037_v2, %v1042_v34 }
 0x3d8   : > { %v1049_v29 = vcombine.low %v1045_v35, %v1046_v15 }
 0x3da   : > { %1051 = vst [vmem:[%s248_s16] sm:$0xff] %v1049_v29 }
 0x3db   : > { %1346 = shalt.err (!%p1343_p3)
}
 0x3dc   : > { %s1347_s12 = scalar_lea.hbm %s1740_s26, 128  ;;  %s1351_s16 = scalar_lea.hbm %s1813_s5, 256 }
 0x3dd   : > { %p1348_p4 = scmp.ne.s32.totalorder %s1740_s26, %s1347_s12  ;;  %p1352_p9 = scmp.lt.u32.totalorder %s1740_s26, %s1813_s5 }
 0x3de   : > { %p1353_p10 = scmp.lt.u32.totalorder %s1351_s16, %s1347_s12  ;;  %p1355_p12 = scmp.lt.u32.totalorder %s1347_s12, %s1740_s26 }
 0x3df   : > { %p1349_p7 = pnand %p1348_p4, %p1507_p5 }
 0x3e0   : > { %p1354_p11 = por %p1353_p10, %p1352_p9 }
 0x3e1   : > { %p1350_p8 = pneg %p1349_p7 }
 0x3e2   : > { %p1356_p13 = por %p1355_p12, %p1354_p11 }
 0x3e4   : > { %p1357_p0 = pnand %p1356_p13, %p1350_p8 }
 0x3e6   : > { %1360 = shalt.err (!%p1357_p0)
}
 0x3e7   : > { %1242 = dma.vmem_to_hbm [thread:$0]  (%p1507_p5), %s1074_s18, 128, %s1740_s26, %s1055_s28  }
 0x3e8   : > { %s1237_s20 = spop %1236  ;;  %s1207_s10 = sshll.u32 %s1490_s25, 4 }
 0x3e9   : > { %s1239_s29 = spop %1238  ;;  %s254_s11 = scalar_lea.vmem [#allocation4], %s1728_s14 }
 0x3ea   : > { %s775_s9 = sadd.f32 %s1239_s29, %s1237_s20  ;;  %s1086_s12 = sshll.u32 %s254_s11, 4  ;;  %s1767_s12 = int_to_ptr.vmem [resolvable:$true] %s1086_s12 }
 0x3eb   : > { %s1765_s26 = scalar_lea.hbm %s1814_s6, %s1207_s10  ;;  %s1060_s28 = scalar_lea.sflag [#allocation5], %s1728_s14 }
 0x3ec   : > { %s1361_s17 = scalar_lea.vmem %s1767_s12, 16  ;;  %s1433_s25 = smov [#allocation4]  }
 0x3ed   : > { %p1362_p1 = scmp.ne.s32.totalorder %s1767_s12, %s1361_s17  ;;  %s1365_s19 = sshll.u32 %s1433_s25, 4  ;;  %s1366_s19 = int_to_ptr.vmem [resolvable:$false] %s1365_s19 }
 0x3ee   : > { %s1367_s20 = scalar_lea.vmem %s1366_s19, 32  ;;  %p1368_p4 = scmp.lt.s32.totalorder %s1767_s12, %s1366_s19 }
 0x3ef   : > { %p1363_p2 = pnand %p1362_p1, %p1507_p5  ;;  %p1369_p7 = scmp.lt.s32.totalorder %s1367_s20, %s1361_s17 }
 0x3f1   : > { %p1364_p3 = pneg %p1363_p2  ;;  %p1370_p8 = por %p1369_p7, %p1368_p4 }
 0x3f3   : > { %p1371_p9 = pnand %p1370_p8, %p1364_p3 }
 0x44e   : > { %v1025_v61 = vpop.xlane.xlu0 %1024 }
 0x44f   : > { %v1026_v36 = vrot.slane %v1025_v61, 4 }
 0x451   : > { %v1027_v37 = vadd.f32 %v1026_v36, %v1025_v61 }
 0x453   : > { %v1028_v38 = vrot.slane %v1027_v37, 2 }
 0x455   : > { %v1029_v43 = vadd.f32 %v1028_v38, %v1027_v37 }
 0x457   : > { %v1030_v44 = vrot.slane %v1029_v43, 1 }
 0x459   : > { %v1031_v46 = vadd.f32 %v1030_v44, %v1029_v43 }
 0x45b   : > { %1240 = vpush %v1031_v46 }
 0x48c   : > { %s1241_s13 = spop %1240 }
 0x48d   : > { %s1033_s15 = sadd.f32 %s1241_s13, %s775_s9 }
 0x48f   : > { %v1052_v47 = vstv %s1033_s15 }
 0x490   : > { %1053 = vst [vmem:[%s254_s11] sm:$0x1] %v1052_v47 }
 0x491   : > { %1374 = shalt.err (!%p1371_p9)
}
 0x492   : > { %s1375_s14 = scalar_lea.hbm %s1765_s26, 16  ;;  %s1379_s10 = scalar_lea.hbm %s1814_s6, 32 }
 0x493   : > { %p1376_p10 = scmp.ne.s32.totalorder %s1765_s26, %s1375_s14  ;;  %p1380_p13 = scmp.lt.u32.totalorder %s1765_s26, %s1814_s6 }
 0x494   : > { %p1381_p0 = scmp.lt.u32.totalorder %s1379_s10, %s1375_s14  ;;  %p1383_p2 = scmp.lt.u32.totalorder %s1375_s14, %s1765_s26 }
 0x495   : > { %p1377_p11 = pnand %p1376_p10, %p1507_p5 }
 0x496   : > { %p1382_p1 = por %p1381_p0, %p1380_p13 }
 0x497   : > { %p1378_p12 = pneg %p1377_p11 }
 0x498   : > { %p1384_p3 = por %p1383_p2, %p1382_p1 }
 0x49a   : > { %p1385_p4 = pnand %p1384_p3, %p1378_p12 }
 0x49c   : > { %1388 = shalt.err (!%p1385_p4)
}
 0x49d   : > { %1243 = dma.vmem_to_hbm [thread:$0]  (%p1507_p5), %s1767_s12, 16, %s1765_s26, %s1060_s28  }
 0x49e PF: > { %p1253_p7 = scmp.ge.s32.totalorder %s1427_s24, 2  ;;  %s1098_s15 = sand.u32 1, %s1415_s21  }
 0x49f   : > { %s1099_s16 = scalar_lea.sflag [#allocation3], %s1098_s15 }
 0x4a0   : > { %p1247_p8 = pnand %p1253_p7, %p1511_p6 }
 0x4a2   : > { %1406 = dma.done.wait (!%p1247_p8), %s1099_s16, 128  }
 0x4a3   : > { %1408 = vsyncadd (!%p1247_p8), %s1099_s16, 4294967168  ;;  %s1108_s18 = scalar_lea.sflag [#allocation5], %s1098_s15 }
 0x4a4   : > { %1410 = dma.done.wait (!%p1247_p8), %s1108_s18, 16  }
 0x4a5   : > { %1412 = vsyncadd (!%p1247_p8), %s1108_s18, 4294967280  ;;  %p20_p5 = scmp.ge.s32.totalorder %s1494_s27, 4   ;;  %s1817_s21 = smov %s1419_s22 }
 0x4a6   : > { %s1818_s22 = smov %s1423_s23  ;;  %s1819_s23 = smov %s1505_s30 }
 0x4a7   : > { %s1820_s24 = smov %s1494_s27  ;;  %22 = sbr.rel (!%p20_p5) target bundleno = 5 (0x5), region = 100 }
 0x4ae   :  { %1112 = vsyncpa [#allocation3], 1 }
 0x4af   :  { %1114 = vsyncpa [#allocation3 + $0x1], 1 }
 0x4b0   :  { %1115 = vsyncpa [#allocation5], 1 }
 0x4b1   :  { %1117 = vsyncpa [#allocation5 + $0x1], 1 }

</bundles_post_ra>
